<compile_context>
chip_gen: v7x
topology: tpu7x:2x2x1
jax: 0.10.0
libtpu: 0.0.40
codegen_flags: <defaults>
</compile_context>

<pallas_src>
import jax
import jax.numpy as jnp
from jax.experimental import pallas as pl
from jax.experimental.pallas import tpu as pltpu


def _make_rmse_kernel(*, B: int, J: int, tb: int, tiles_per_part: int,
                      total_tiles: int, num_parts: int):
    # Python floats -> jaxpr literals (NOT captured jax.Array constants).
    inv_j = 1.0 / float(J)
    inv_b = 1.0 / float(B)

    partial_last = (B % tb) != 0
    # Mask is needed only if the last real tile is partial, or if uneven
    # part-splitting produced duplicated (clamped) tiles at the end.
    needs_mask = partial_last or (num_parts * tiles_per_part != total_tiles)
    first_maskable = total_tiles - 1 if partial_last else total_tiles

    def kernel(gt_ref, pred_ref, out_ref, acc_ref):
        p = pl.program_id(0)          # part (TensorCore partial)
        i = pl.program_id(1)          # tile within part

        @pl.when(i == 0)
        def _init():
            acc_ref[...] = jnp.zeros_like(acc_ref)

        gt = gt_ref[...].astype(jnp.float32)      # (tb, J*C)
        pred = pred_ref[...].astype(jnp.float32)  # (tb, J*C)
        diff = gt - pred
        # sum over flattened (joint, coord) lane axis, then /J  ==  mean_j(||.||^2)
        ssq = jnp.sum(diff * diff, axis=-1, keepdims=True)   # (tb, 1)
        per_row = jnp.sqrt(ssq * inv_j)                       # (tb, 1), sqrt on EUP

        if not needs_mask:
            # B % tb == 0 and no duplicated tiles: mask removed at trace time.
            acc_ref[...] += jnp.sum(per_row, axis=0, keepdims=True)
        else:
            t = p * tiles_per_part + i            # global (unclamped) tile index

            @pl.when(t < first_maskable)
            def _full_tile():
                acc_ref[...] += jnp.sum(per_row, axis=0, keepdims=True)

            @pl.when(t >= first_maskable)
            def _edge_tile():
                # Rows past the true batch end (including fully-duplicated
                # clamped tiles, whose t*tb >= B) contribute 0.
                row_ids = t * tb + jax.lax.broadcasted_iota(jnp.int32, (tb, 1), 0)
                masked = jnp.where(row_ids < B, per_row, 0.0)
                acc_ref[...] += jnp.sum(masked, axis=0, keepdims=True)

        @pl.when(i == pl.num_programs(1) - 1)
        def _finalize():
            # Per-part partial of mean_b(...): already carries the 1/B factor.
            out_ref[...] = jnp.broadcast_to(acc_ref[...] * inv_b, out_ref.shape)

    return kernel


def rmse(gt: jax.Array, pred: jax.Array, *, tb: int | None = None,
         num_parts: int = 2) -> jax.Array:
    assert gt.shape == pred.shape and gt.ndim == 3
    B, J, C = gt.shape
    JC = J * C

    # Flatten (J, C) -> J*C so the squared-distance reduction lives on a dense
    # lane axis (free reshape: contiguous).
    gt2 = gt.reshape(B, JC)
    pred2 = pred.reshape(B, JC)

    # Tile selection: padded (lane dim -> 128) double-buffered f32 inputs cost
    # tb*128*4*2*2 bytes (tb=8192 -> 16 MiB), comfortably under v7x's 64 MiB
    # physical VMEM, and keeps the (tb,1) per-row EUP sqrt from becoming the
    # binding slot on v7x's fast HBM.
    if tb is None:
        tb = B if B <= 8192 else 8192
    total_tiles = pl.cdiv(B, tb)

    # Per-core partial sums: leading "parallel" axis lets v7x's 2 TensorCores
    # each reduce half the batch tiles.  v5e/v6e (1 TC) run it sequentially.
    num_parts = max(1, min(num_parts, total_tiles))
    tiles_per_part = pl.cdiv(total_tiles, num_parts)

    if num_parts * tiles_per_part == total_tiles:
        def in_index_map(p, i):
            return (p * tiles_per_part + i, 0)
    else:
        # Uneven split: clamp duplicated trailing tiles onto the last valid
        # tile (their rows are masked out in-kernel, so they contribute 0).
        def in_index_map(p, i):
            return (jnp.minimum(p * tiles_per_part + i, total_tiles - 1), 0)

    kernel = _make_rmse_kernel(B=B, J=J, tb=tb, tiles_per_part=tiles_per_part,
                               total_tiles=total_tiles, num_parts=num_parts)

    out = pl.pallas_call(
        kernel,
        # Lane-dense (8,128) block per part -> unmasked vector stores, and a
        # layout-conforming output BlockSpec.
        out_shape=jax.ShapeDtypeStruct((num_parts * 8, 128), jnp.float32),
        grid_spec=pltpu.PrefetchScalarGridSpec(
            num_scalar_prefetch=0,
            grid=(num_parts, tiles_per_part),
            in_specs=[
                pl.BlockSpec((tb, JC), in_index_map),
                pl.BlockSpec((tb, JC), in_index_map),
            ],
            out_specs=pl.BlockSpec((8, 128), lambda p, i: (p, 0)),
            scratch_shapes=[pltpu.VMEM((1, 1), jnp.float32)],
        ),
        compiler_params=pltpu.CompilerParams(
            dimension_semantics=("parallel", "arbitrary"),
            # 16 MiB of double-buffered inputs at tb=8192 (f32) + headroom;
            # above v5e's 16 MiB scoped default, below v7x's 64 MiB physical.
            vmem_limit_bytes=32 * 1024 * 1024,
        ),
    )(gt2, pred2)

    # Sum the per-part partial means (each already scaled by 1/B).
    return jnp.sum(out[::8, 0])


def _reference(gt, pred):
    diff_sq = jnp.sum((gt.astype(jnp.float32) - pred.astype(jnp.float32)) ** 2, axis=-1)
    return jnp.mean(jnp.sqrt(jnp.mean(diff_sq, axis=-1)))


if __name__ == "__main__":
    key = jax.random.PRNGKey(0)
    k1, k2, k3, k4 = jax.random.split(key, 4)

    # 19 joints, 3D coordinates (the "joints" branch of the PyTorch module).
    B, J, C = 2, 19, 3
    gt = jax.random.normal(k1, (B, J, C), dtype=jnp.float32)
    pred = jax.random.normal(k2, (B, J, C), dtype=jnp.float32)

    out = rmse(gt, pred)
    jax.block_until_ready(out)
    ref = _reference(gt, pred)
    assert jnp.allclose(out, ref, rtol=1e-5, atol=1e-5), (out, ref)

    # Second small check exercising multi-tile grid, two-part partial sums and
    # the gated edge mask (B not a multiple of tb, uneven tile split).
    B2 = 20
    gt2 = jax.random.normal(k3, (B2, J, C), dtype=jnp.float32)
    pred2 = jax.random.normal(k4, (B2, J, C), dtype=jnp.float32)
    out2 = rmse(gt2, pred2, tb=8, num_parts=2)
    jax.block_until_ready(out2)
    ref2 = _reference(gt2, pred2)
    assert jnp.allclose(out2, ref2, rtol=1e-5, atol=1e-5), (out2, ref2)

    print("KERNEL_OK")
</pallas_src>

<mosaic_0001>
module attributes {stable_mosaic.version = 11 : i64} {
  func.func @kernel(%arg0: i32, %arg1: i32, %arg2: memref<2x57xf32, #tpu.memory_space<vmem>>, %arg3: memref<2x57xf32, #tpu.memory_space<vmem>>, %arg4: memref<8x128xf32, #tpu.memory_space<vmem>>, %arg5: memref<1x1xf32, #tpu.memory_space<vmem>>) attributes {dimension_semantics = [#tpu.dimension_semantics<parallel>, #tpu.dimension_semantics<arbitrary>], iteration_bounds = array<i64: 1, 1>, scalar_prefetch = 0 : i64, scratch_operands = 1 : i64, tpu.core_type = #tpu.core_type<tc>, window_params = [{transform_indices = @transform_0, window_bounds = array<i64: 2, 57>}, {transform_indices = @transform_1, window_bounds = array<i64: 2, 57>}, {transform_indices = @transform_2, window_bounds = array<i64: 8, 128>}]} {
    %c0_i32 = arith.constant 0 : i32
    %0 = arith.cmpi eq, %arg1, %c0_i32 : i32
    %1 = arith.extui %0 : i1 to i32
    %c0_i32_0 = arith.constant 0 : i32
    %2 = arith.cmpi ne, %1, %c0_i32_0 : i32
    scf.if %2 {
      %cst_12 = arith.constant 0.000000e+00 : f32
      %20 = vector.broadcast %cst_12 : f32 to vector<1x1xf32>
      %c0_13 = arith.constant 0 : index
      %c0_14 = arith.constant 0 : index
      %21 = vector.load %arg5[%c0_13, %c0_14] : memref<1x1xf32, #tpu.memory_space<vmem>>, vector<1x1xf32>
      tpu.vector_store %arg5[%c0_13, %c0_14], %20 {strides = array<i32>} : memref<1x1xf32, #tpu.memory_space<vmem>>, vector<1x1xf32>,
    } else {
    }
    %c0 = arith.constant 0 : index
    %c0_1 = arith.constant 0 : index
    %3 = vector.load %arg2[%c0, %c0_1] : memref<2x57xf32, #tpu.memory_space<vmem>>, vector<2x57xf32>
    %c0_2 = arith.constant 0 : index
    %c0_3 = arith.constant 0 : index
    %4 = vector.load %arg3[%c0_2, %c0_3] : memref<2x57xf32, #tpu.memory_space<vmem>>, vector<2x57xf32>
    %5 = arith.subf %3, %4 : vector<2x57xf32>
    %6 = arith.mulf %5, %5 : vector<2x57xf32>
    %cst = arith.constant dense<0.000000e+00> : vector<2xf32>
    %7 = vector.multi_reduction <add>, %6, %cst [1] : vector<2x57xf32> to vector<2xf32>
    %8 = vector.shape_cast %7 : vector<2xf32> to vector<2x1xf32>
    %cst_4 = arith.constant 0.0526315793 : f32
    %9 = vector.broadcast %cst_4 : f32 to vector<2x1xf32>
    %10 = arith.mulf %8, %9 : vector<2x1xf32>
    %11 = math.sqrt %10 : vector<2x1xf32>
    %c0_5 = arith.constant 0 : index
    %c0_6 = arith.constant 0 : index
    %12 = vector.load %arg5[%c0_5, %c0_6] : memref<1x1xf32, #tpu.memory_space<vmem>>, vector<1x1xf32>
    %cst_7 = arith.constant dense<0.000000e+00> : vector<1xf32>
    %13 = vector.multi_reduction <add>, %11, %cst_7 [0] : vector<2x1xf32> to vector<1xf32>
    %14 = vector.shape_cast %13 : vector<1xf32> to vector<1x1xf32>
    %15 = arith.addf %12, %14 : vector<1x1xf32>
    %c0_8 = arith.constant 0 : index
    %c0_9 = arith.constant 0 : index
    %16 = vector.load %arg5[%c0_8, %c0_9] : memref<1x1xf32, #tpu.memory_space<vmem>>, vector<1x1xf32>
    tpu.vector_store %arg5[%c0_8, %c0_9], %15 {strides = array<i32>} : memref<1x1xf32, #tpu.memory_space<vmem>>, vector<1x1xf32>,
    %c0_i32_10 = arith.constant 0 : i32
    %17 = arith.cmpi eq, %arg1, %c0_i32_10 : i32
    %18 = arith.extui %17 : i1 to i32
    %c0_i32_11 = arith.constant 0 : i32
    %19 = arith.cmpi ne, %18, %c0_i32_11 : i32
    scf.if %19 {
      %c0_12 = arith.constant 0 : index
      %c0_13 = arith.constant 0 : index
      %20 = vector.load %arg5[%c0_12, %c0_13] : memref<1x1xf32, #tpu.memory_space<vmem>>, vector<1x1xf32>
      %cst_14 = arith.constant 5.000000e-01 : f32
      %21 = vector.broadcast %cst_14 : f32 to vector<1x1xf32>
      %22 = arith.mulf %20, %21 : vector<1x1xf32>
      %23 = vector.shape_cast %22 : vector<1x1xf32> to vector<1x1xf32>
      %24 = vector.broadcast %23 : vector<1x1xf32> to vector<8x128xf32>
      %c0_15 = arith.constant 0 : index
      %c0_16 = arith.constant 0 : index
      %25 = vector.load %arg4[%c0_15, %c0_16] : memref<8x128xf32, #tpu.memory_space<vmem>>, vector<8x128xf32>
      tpu.vector_store %arg4[%c0_15, %c0_16], %24 {strides = array<i32>} : memref<8x128xf32, #tpu.memory_space<vmem>>, vector<8x128xf32>,
    } else {
    }
    return
  }
  func.func @transform_0(%arg0: i32, %arg1: i32) -> (i32, i32) {
    %c1_i32 = arith.constant 1 : i32
    %0 = arith.muli %arg0, %c1_i32 : i32
    %1 = arith.addi %0, %arg1 : i32
    %c0_i32 = arith.constant 0 : i32
    %c0_i32_0 = arith.constant 0 : i32
    return %1, %c0_i32 : i32, i32
  }
  func.func @transform_1(%arg0: i32, %arg1: i32) -> (i32, i32) {
    %c1_i32 = arith.constant 1 : i32
    %0 = arith.muli %arg0, %c1_i32 : i32
    %1 = arith.addi %0, %arg1 : i32
    %c0_i32 = arith.constant 0 : i32
    %c0_i32_0 = arith.constant 0 : i32
    return %1, %c0_i32 : i32, i32
  }
  func.func @transform_2(%arg0: i32, %arg1: i32) -> (i32, i32) {
    %c0_i32 = arith.constant 0 : i32
    %c0_i32_0 = arith.constant 0 : i32
    return %arg0, %c0_i32 : i32, i32
  }
}

</mosaic_0001>

<bundles_post_ra>
// kernel: tpu_custom_call.1
= control target key start
LH: loop header
LB: loop body
LE: loop exit
PB: predicated region body
PF: predicated region fallthrough
CT: control target
= control target key end

     0   :  { %7 = vsyncpa [#allocation4], 0  ;;  %s218_s0 = inlined_call_operand.hbm [shape: f32[2,57], index: 0, kind: input, shape index: {}]   ;;  %s219_s1 = inlined_call_operand.vmem [shape: f32[2,57], index: 1, kind: input, shape index: {}]   ;;  %s220_s2 = inlined_call_operand.hbm [shape: f32[8,128], index: 2, kind: output, shape index: {}]  }
   0x1   :  { %8 = vsyncpa [#allocation5], 0  ;;  %s170_s9 = smov [#allocation3]   ;;  %s122_s13 = scalar_lea.hbm %s218_s0, 32 }
   0x2   :  { %s18_s10 = sshll.u32 %s170_s9, 4  ;;  %p123_p0 = scmp.ne.s32.totalorder %s218_s0, %s122_s13  ;;  %s19_s10 = int_to_ptr.vmem [resolvable:$true] %s18_s10 }
   0x3   :  { %p126_p1 = scmp.lt.u32.totalorder %s122_s13, %s218_s0 }
   0x5   :  { %p128_p2 = pnand %p126_p1, %p123_p0 }
   0x7   :  { %131 = shalt.err (!%p128_p2)
}
   0x8   :  { %s132_s18 = scalar_lea.vmem %s19_s10, 32  ;;  %p137_p4 = scmp.lt.s32.totalorder %s19_s10, %s19_s10 }
   0x9   :  { %p133_p3 = scmp.ne.s32.totalorder %s19_s10, %s132_s18  ;;  %p138_p5 = scmp.lt.s32.totalorder %s132_s18, %s132_s18 }
   0xb   :  { %p139_p6 = por %p138_p5, %p137_p4 }
   0xd   :  { %p140_p7 = pnand %p139_p6, %p133_p3 }
   0xf   :  { %143 = shalt.err (!%p140_p7)
}
  0x10   :  { %21 = dma.hbm_to_vmem [thread:$0]  %s218_s0, 32, %s19_s10, [#allocation4]  }
  0x11   :  { %166 = dma.done.wait [#allocation4], 32  }
  0x12   :  { %167 = vsyncadd [#allocation4], 4294967264  ;;  %vm49_vm0 = vcmask 0   ;;  %v171_v0 = vmov 0.0   ;;  %v51_v1 = vld [vmem:[#allocation3] sm:$0x3]  ;;  %v85_v23 = vlaneseq }
  0x13   :  { %50 = vst.msk [vmem:[#allocation2] sm:$0x1] %vm49_vm0, %v171_v0  ;;  %v52_v2 = vld [vmem:[%s219_s1] sm:$0x3]  ;;  %vm55_vm1 = vcmask 459776   ;;  %v172_v6 = vmov 0  }
  0x14   :  { %v53_v3 = vsub.f32 %v51_v1, %v52_v2  ;;  %119 = vset.pattern.permute.xlu0 %v172_v6  ;;  %vm68_vm2 = vcmask 1041408   ;;  %v86_v24 = vshrl.u32 %v85_v23, 7  ;;  %s173_s0 = smov [#allocation6]  }
  0x15   :  { %s100_s1 = sshll.u32 %s173_s0, 4  ;;  %s101_s1 = int_to_ptr.vmem [resolvable:$true] %s100_s1 }
  0x16   :  { %v54_v4 = vmul.f32 %v53_v3, %v53_v3  ;;  %v87_v25 = vsub.s32 0, %v86_v24  ;;  %s144_s23 = scalar_lea.vmem %s101_s1, 128  ;;  %p149_p9 = scmp.lt.s32.totalorder %s101_s1, %s101_s1 }
  0x17   :  { %p145_p8 = scmp.ne.s32.totalorder %s101_s1, %s144_s23  ;;  %p150_p10 = scmp.lt.s32.totalorder %s144_s23, %s144_s23 }
  0x18   :  { %v56_v5 = vsel %vm55_vm1, %v54_v4, 0.0 }
  0x19   :  { %57 = vadd.xlane.f32.xlu0 %v56_v5  ;;  %p151_p11 = por %p150_p10, %p149_p9 }
  0x1a   :  { %v67_v20 = vld [vmem:[#allocation2] sm:$0x1] }
  0x1b   :  { %p152_p12 = pnand %p151_p11, %p145_p8 }
  0xa6   :  { %v58_v7 = vpop.xlane.xlu0 %57 }
  0xa7   :  { %v59_v8 = vmul.f32 0.05263158, %v58_v7 }
  0xa9   :  { %120 = vrsqrt.f32 %v59_v8  ;;  %vm62_vm3 = vcmp.eq.f32.partialorder %v59_v8, inf  ;;  %v65_v11 = vand.u32 2147483648, %v59_v8  ;;  %vm64_vm4 = vcmp.eq.f32.partialorder %v59_v8, 0.0 }
  0xb3   :  { %v121_v9 = vpop.eup %120 }
  0xb4   :  { %v61_v10 = vmul.f32 %v121_v9, %v59_v8 }
  0xb6   :  { %v63_v12 = vsel %vm62_vm3, %v59_v8, %v61_v10 }
  0xb7   :  { %v66_v13 = vsel %vm64_vm4, %v65_v11, %v63_v12 }
  0xb8   :  { %v69_v14 = vsel %vm68_vm2, %v66_v13, 0.0 }
  0xb9   :  { %v70_v15 = vrot.slane %v69_v14, 4 }
  0xbb   :  { %v71_v16 = vadd.f32 %v70_v15, %v69_v14 }
  0xbd   :  { %v72_v17 = vrot.slane %v71_v16, 2 }
  0xbf   :  { %v73_v18 = vadd.f32 %v72_v17, %v71_v16 }
  0xc1   :  { %v74_v19 = vrot.slane %v73_v18, 1 }
  0xc3   :  { %v75_v21 = vadd.f32 %v74_v19, %v73_v18 }
  0xc5   :  { %v76_v22 = vadd.f32 %v75_v21, %v67_v20 }
  0xc7   :  { %78 = vst.msk [vmem:[#allocation2] sm:$0x1] %vm49_vm0, %v76_v22 }
  0xce   :  { %v82_v26 = vld [vmem:[#allocation2] sm:$0x1] }
  0xcf   :  { %v83_v27 = vmul.f32 0.5, %v82_v26 }
  0xd1   :  { %v88_v28 = vrot.slane %v83_v27, %v87_v25 }
  0xd3   :  { %90 = vperm.xlu0 %119, %v88_v28  }
 0x152   :  { %v91_v29 = vpop.permute.xlu0 %90 }
 0x153   :  { %93 = vst [vmem:[#allocation6] sm:$0xff] %v91_v29 }
 0x154   :  { %155 = shalt.err (!%p152_p12)
}
 0x155   :  { %s156_s26 = scalar_lea.hbm %s220_s2, 128 }
 0x156   :  { %p157_p13 = scmp.ne.s32.totalorder %s220_s2, %s156_s26  ;;  %p160_p0 = scmp.lt.u32.totalorder %s156_s26, %s220_s2 }
 0x158   :  { %p162_p1 = pnand %p160_p0, %p157_p13 }
 0x15a   :  { %165 = shalt.err (!%p162_p1)
}
 0x15b   :  { %103 = dma.vmem_to_hbm [thread:$0]  %s101_s1, 128, %s220_s2, [#allocation5]  }
 0x15c   :  { %168 = dma.done.wait [#allocation5], 128  }
 0x15d   :  { %169 = vsyncadd [#allocation5], 4294967168 }
 0x15e   :  { %107 = vsyncpa [#allocation4], 1 }
 0x15f   :  { %108 = vsyncpa [#allocation5], 1 }

</bundles_post_ra>
